<compile_context>
chip_gen: v5e
topology: v5e:2x2
jax: 0.10.0
libtpu: 0.0.40
codegen_flags: <defaults>
</compile_context>

<pallas_src>
import functools
import math

import jax
import jax.numpy as jnp
from jax.experimental import pallas as pl
from jax.experimental.pallas import tpu as pltpu


# --------------------------------------------------------------------------- #
# Kernel-side helpers
# --------------------------------------------------------------------------- #
def _project(x, w_ref, b_ref, compute_dtype):
    """One (rows, E_in) @ (E_in, cols) projection; f32 accumulate, cast early."""
    return (jnp.dot(x, w_ref[...], preferred_element_type=jnp.float32)
            + b_ref[...]).astype(compute_dtype)


def _softmax_last(s, *, approx_recip):
    s = s - jnp.max(s, axis=-1, keepdims=True)
    p = jnp.exp(s)
    denom = jnp.sum(p, axis=-1, keepdims=True)
    return p * pl.reciprocal(denom, approx=approx_recip)       # EUP slot


def _attend_and_project(Q, K, V, wo_ref, bo_ref, o_ref, *, nheads, E_head,
                        E_total, NB, Lq, Lkv, compute_dtype, approx_recip):
    """Q: (NB*Lq, E_total), K/V: (NB*Lkv, E_total), all compute_dtype."""
    # Leading-dim-only reshapes (free): no lane/sublane movement.
    Qb = Q.reshape(NB, Lq, E_total)
    Kb = K.reshape(NB, Lkv, E_total)
    Vb = V.reshape(NB, Lkv, E_total)

    # Per-head, batched over the NB batch rows.  Head outputs stay in vregs in
    # compute_dtype and are merged with ONE concatenate (single relayout) -- no
    # f32 scratch, no masked sub-128-lane scratch stores.
    heads = []
    for h in range(nheads):                       # nheads is small and static
        sl = slice(h * E_head, (h + 1) * E_head)
        # 1/sqrt(E_head) is folded into wq/bq on the host.
        s = jnp.einsum('nqd,nkd->nqk', Qb[:, :, sl], Kb[:, :, sl],
                       preferred_element_type=jnp.float32)      # (NB, Lq, Lkv)
        p = _softmax_last(s, approx_recip=approx_recip)
        oh = jnp.einsum('nqk,nkd->nqd', p.astype(compute_dtype), Vb[:, :, sl],
                        preferred_element_type=jnp.float32)      # (NB, Lq, E_head)
        heads.append(oh.reshape(NB * Lq, E_head).astype(compute_dtype))
    attn = jnp.concatenate(heads, axis=-1) if nheads > 1 else heads[0]

    # Output projection on the whole (NB*Lq, E_total) slab; lane-dense store.
    out = jnp.dot(attn, wo_ref[...], preferred_element_type=jnp.float32) + bo_ref[...]
    o_ref[...] = out.astype(o_ref.dtype)


def _mha_kernel_general(q_ref, k_ref, v_ref, wq_ref, wk_ref, wv_ref, wo_ref,
                        bq_ref, bk_ref, bv_ref, bo_ref, o_ref,
                        *, attend, compute_dtype):
    Q = _project(q_ref[...], wq_ref, bq_ref, compute_dtype)
    K = _project(k_ref[...], wk_ref, bk_ref, compute_dtype)
    V = _project(v_ref[...], wv_ref, bv_ref, compute_dtype)
    attend(Q, K, V, wo_ref, bo_ref, o_ref)


def _mha_kernel_kv_packed(q_ref, kv_ref, wq_ref, wkv_ref, wo_ref,
                          bq_ref, bkv_ref, bo_ref, o_ref,
                          *, attend, compute_dtype, E_total):
    # key is value: fused K|V projection -> one matmul with 2*E_total columns.
    Q = _project(q_ref[...], wq_ref, bq_ref, compute_dtype)
    KV = _project(kv_ref[...], wkv_ref, bkv_ref, compute_dtype)
    attend(Q, KV[:, :E_total], KV[:, E_total:], wo_ref, bo_ref, o_ref)


def _mha_kernel_qkv_packed(x_ref, wqkv_ref, wo_ref, bqkv_ref, bo_ref, o_ref,
                           *, attend, compute_dtype, E_total):
    # query is key is value: fused Q|K|V projection (3*E_total columns).
    P = _project(x_ref[...], wqkv_ref, bqkv_ref, compute_dtype)
    attend(P[:, :E_total], P[:, E_total:2 * E_total], P[:, 2 * E_total:],
           wo_ref, bo_ref, o_ref)


# --------------------------------------------------------------------------- #
# Host-side block-size selection
# --------------------------------------------------------------------------- #
def _pick_batch_block(N, Lq, Lkv, vmem_estimate, vmem_budget, multi_core):
    """Pick NB (batch elems per grid step): biggest VMEM-fitting block, with an
    even number of grid steps on multi-TensorCore chips (v7x), MXU-friendly row
    counts preferred, and the (8,128) rule satisfied for q AND k/v blocks."""
    def shape_ok(nb):
        if N % nb:
            return False
        if (nb * Lq) % 8 and nb != N:
            return False
        if (nb * Lkv) % 8 and nb != N:
            return False
        return True

    cands = [nb for nb in range(1, N + 1) if shape_ok(nb)]
    if not cands:
        return N
    fitting = [nb for nb in cands if vmem_estimate(nb) <= vmem_budget]
    pool = fitting if fitting else [min(cands)]
    if multi_core:
        even = [nb for nb in pool if (N // nb) % 2 == 0]
        if even:
            pool = even
    # Favour row counts that are multiples of 256 / 128 (MXU fill), then size.
    return max(pool, key=lambda nb: ((nb * Lq) % 256 == 0, (nb * Lq) % 128 == 0, nb))


# --------------------------------------------------------------------------- #
# Forward wrapper
# --------------------------------------------------------------------------- #
def mha_nested_forward(query, key, value, params, *, nheads,
                       compute_dtype=jnp.bfloat16, approx_recip=None,
                       batch_block=None, weight_buffers=2):
    """query (N, Lq, E_q), key (N, Lkv, E_k), value (N, Lkv, E_v) -> (N, Lq, E_q).

    compute_dtype:  dtype fed to the MXU (bf16 recommended; accumulation and
                    softmax math stay f32).
    approx_recip:   EUP approximate reciprocal for softmax normalization.
                    Default: only when compute_dtype is not f32.
    weight_buffers: pipeline buffer count for the grid-invariant weights/biases
                    (1 = single-buffered via pl.Buffered, saves VMEM on v7x).
    """
    wqkv, bqkv, wo, bo = params
    N, Lq, E_q = query.shape
    Nk, Lkv, E_k = key.shape
    Nv, Lv, E_v = value.shape
    assert N == Nk == Nv and Lkv == Lv
    E_total = wqkv.shape[0] // 3
    E_out = wo.shape[0]
    assert E_total % nheads == 0
    E_head = E_total // nheads
    if approx_recip is None:
        approx_recip = jnp.dtype(compute_dtype) != jnp.dtype(jnp.float32)
    cdt = compute_dtype

    # --- mode dispatch (mirrors the PyTorch module's identity checks) --------
    if query is key and key is value:
        mode = "qkv"
    elif key is value:
        mode = "kv"
    else:
        mode = "general"

    # --- host-side (grid-invariant) weight prep ------------------------------
    scale = 1.0 / math.sqrt(E_head)
    wq, wk, wv = jnp.split(wqkv, 3, axis=0)             # (E_total, E) each
    bq, bk, bv = jnp.split(bqkv, 3, axis=0)             # (E_total,) each
    # Pre-transpose (contract last x last dim, no in-kernel transposes) and fold
    # the 1/sqrt(E_head) attention scale into the Q projection.
    wq_t = (wq * scale).T.astype(cdt)                   # (E_q, E_total)
    wk_t = wk.T.astype(cdt)                             # (E_k, E_total)
    wv_t = wv.T.astype(cdt)                             # (E_v, E_total)
    wo_t = wo.T.astype(cdt)                             # (E_total, E_out)
    bq2 = (bq * scale).reshape(1, E_total).astype(jnp.float32)
    bk2 = bk.reshape(1, E_total).astype(jnp.float32)
    bv2 = bv.reshape(1, E_total).astype(jnp.float32)
    bo2 = bo.reshape(1, E_out).astype(jnp.float32)

    # --- generation-aware VMEM budget / block sizing --------------------------
    vmem_cap = 0
    try:
        vmem_cap = int(pltpu.get_tpu_info().vmem_capacity_bytes)
    except Exception:
        vmem_cap = 0
    if vmem_cap < (32 << 20):
        vmem_cap = 64 << 20                              # conservative fallback
    try:
        kind = jax.devices()[0].device_kind.lower()
    except Exception:
        kind = ""
    multi_core = ("v7" in kind) or (vmem_cap <= (64 << 20))
    vmem_limit = min(vmem_cap * 3 // 4, 112 << 20)
    vmem_budget = int(vmem_limit * 0.8)

    cdt_bytes = jnp.dtype(cdt).itemsize
    out_bytes = jnp.dtype(query.dtype).itemsize
    w_bytes = (cdt_bytes * ((E_q + E_k + E_v) * E_total + E_total * E_out)
               + 4 * (3 * E_total + E_out))

    def vmem_estimate(nb):
        rq, rkv = nb * Lq, nb * Lkv
        act = 2 * cdt_bytes * (rq * E_q + rkv * (E_k + E_v)) + 2 * out_bytes * rq * E_out
        weights = weight_buffers * w_bytes
        temps = cdt_bytes * (2 * rq + 2 * rkv) * E_total     # Q/K/V proj + merged heads
        temps += 3 * 4 * nb * Lq * Lkv                        # one head's f32 score temps
        return act + weights + temps

    NB = (_pick_batch_block(N, Lq, Lkv, vmem_estimate, vmem_budget, multi_core)
          if batch_block is None else batch_block)
    assert N % NB == 0
    n_blocks = N // NB

    # --- flatten activations to batch-major 2-D slabs ------------------------
    qf = query.reshape(N * Lq, E_q).astype(cdt)
    kf = key.reshape(N * Lkv, E_k).astype(cdt) if mode != "qkv" else None
    vf = value.reshape(N * Lkv, E_v).astype(cdt) if mode == "general" else None

    attend = functools.partial(
        _attend_and_project, nheads=nheads, E_head=E_head, E_total=E_total,
        NB=NB, Lq=Lq, Lkv=Lkv, compute_dtype=cdt, approx_recip=approx_recip)

    def act_spec(rows, cols):
        return pl.BlockSpec((rows, cols), lambda n: (n, 0))

    def const_spec(shape):
        # Grid-invariant weights / biases (index map is constant).
        if weight_buffers == 2:
            return pl.BlockSpec(shape, lambda n: (0, 0))
        return pl.BlockSpec(shape, lambda n: (0, 0),
                            pipeline_mode=pl.Buffered(weight_buffers))

    if mode == "general":
        kernel = functools.partial(_mha_kernel_general, attend=attend,
                                   compute_dtype=cdt)
        operands = (qf, kf, vf, wq_t, wk_t, wv_t, wo_t, bq2, bk2, bv2, bo2)
        in_specs = [act_spec(NB * Lq, E_q), act_spec(NB * Lkv, E_k),
                    act_spec(NB * Lkv, E_v),
                    const_spec((E_q, E_total)), const_spec((E_k, E_total)),
                    const_spec((E_v, E_total)), const_spec((E_total, E_out)),
                    const_spec((1, E_total)), const_spec((1, E_total)),
                    const_spec((1, E_total)), const_spec((1, E_out))]
    elif mode == "kv":
        wkv_t = jnp.concatenate([wk_t, wv_t], axis=1)    # (E_k, 2*E_total)
        bkv2 = jnp.concatenate([bk2, bv2], axis=1)       # (1, 2*E_total)
        kernel = functools.partial(_mha_kernel_kv_packed, attend=attend,
                                   compute_dtype=cdt, E_total=E_total)
        operands = (qf, kf, wq_t, wkv_t, wo_t, bq2, bkv2, bo2)
        in_specs = [act_spec(NB * Lq, E_q), act_spec(NB * Lkv, E_k),
                    const_spec((E_q, E_total)), const_spec((E_k, 2 * E_total)),
                    const_spec((E_total, E_out)),
                    const_spec((1, E_total)), const_spec((1, 2 * E_total)),
                    const_spec((1, E_out))]
    else:  # "qkv": fully packed self-attention projection
        wqkv_t = jnp.concatenate([wq_t, wk_t, wv_t], axis=1)   # (E_q, 3*E_total)
        bqkv2 = jnp.concatenate([bq2, bk2, bv2], axis=1)        # (1, 3*E_total)
        kernel = functools.partial(_mha_kernel_qkv_packed, attend=attend,
                                   compute_dtype=cdt, E_total=E_total)
        operands = (qf, wqkv_t, wo_t, bqkv2, bo2)
        in_specs = [act_spec(NB * Lq, E_q),
                    const_spec((E_q, 3 * E_total)), const_spec((E_total, E_out)),
                    const_spec((1, 3 * E_total)), const_spec((1, E_out))]

    out2d = pl.pallas_call(
        kernel,
        out_shape=jax.ShapeDtypeStruct((N * Lq, E_out), query.dtype),
        grid_spec=pltpu.PrefetchScalarGridSpec(
            num_scalar_prefetch=0,
            grid=(n_blocks,),
            in_specs=in_specs,
            out_specs=pl.BlockSpec((NB * Lq, E_out), lambda n: (n, 0)),
        ),
        # Batch-block axis is independent work -> shard across TensorCores.
        compiler_params=pltpu.CompilerParams(
            dimension_semantics=("parallel",),
            vmem_limit_bytes=int(vmem_limit)),
    )(*operands)

    return out2d.reshape(N, Lq, E_out)


# --------------------------------------------------------------------------- #
# Pure-JAX reference + init (mirrors the PyTorch module, f32)
# --------------------------------------------------------------------------- #
def mha_nested_reference(query, key, value, params, *, nheads):
    wqkv, bqkv, wo, bo = params
    E_total = wqkv.shape[0] // 3
    E_head = E_total // nheads
    wq, wk, wv = jnp.split(wqkv, 3, axis=0)
    bq, bk, bv = jnp.split(bqkv, 3, axis=0)
    Q = query @ wq.T + bq
    K = key @ wk.T + bk
    V = value @ wv.T + bv

    def split_heads(x):
        N, L, _ = x.shape
        return x.reshape(N, L, nheads, E_head).transpose(0, 2, 1, 3)

    Qh, Kh, Vh = split_heads(Q), split_heads(K), split_heads(V)
    s = jnp.einsum("nhqd,nhkd->nhqk", Qh, Kh) / math.sqrt(E_head)
    p = jax.nn.softmax(s, axis=-1)
    o = jnp.einsum("nhqk,nhkd->nhqd", p, Vh)
    o = o.transpose(0, 2, 1, 3).reshape(query.shape[0], query.shape[1], E_total)
    return o @ wo.T + bo


def init_params(key, E_q, E_k, E_v, E_total):
    # nn.Linear default init: U(-1/sqrt(fan_in), 1/sqrt(fan_in))
    assert E_q == E_k == E_v  # packed-projection path
    k1, k2, k3, k4 = jax.random.split(key, 4)
    bound_in = 1.0 / math.sqrt(E_q)
    wqkv = jax.random.uniform(k1, (3 * E_total, E_q), jnp.float32, -bound_in, bound_in)
    bqkv = jax.random.uniform(k2, (3 * E_total,), jnp.float32, -bound_in, bound_in)
    bound_out = 1.0 / math.sqrt(E_total)
    wo = jax.random.uniform(k3, (E_q, E_total), jnp.float32, -bound_out, bound_out)
    bo = jax.random.uniform(k4, (E_q,), jnp.float32, -bound_out, bound_out)
    return wqkv, bqkv, wo, bo


if __name__ == "__main__":
    # Small shapes consistent with the module's forward signature.
    N, L_q, L_kv = 2, 8, 8
    E_q = E_k = E_v = 32
    E_total, nheads = 32, 4

    root = jax.random.PRNGKey(0)
    kp, kq, kk, kv = jax.random.split(root, 4)
    params = init_params(kp, E_q, E_k, E_v, E_total)

    query = jax.random.normal(kq, (N, L_q, E_q), jnp.float32)
    key = jax.random.normal(kk, (N, L_kv, E_k), jnp.float32)
    value = jax.random.normal(kv, (N, L_kv, E_v), jnp.float32)

    # --- general (distinct q/k/v) path: exact f32 then fast bf16 -------------
    ref = mha_nested_reference(query, key, value, params, nheads=nheads)
    out_f32 = jax.block_until_ready(
        mha_nested_forward(query, key, value, params, nheads=nheads,
                           compute_dtype=jnp.float32))
    assert out_f32.shape == (N, L_q, E_q)
    assert jnp.allclose(out_f32, ref, atol=1e-4, rtol=1e-4), (
        float(jnp.max(jnp.abs(out_f32 - ref))))

    out_bf16 = jax.block_until_ready(
        mha_nested_forward(query, key, value, params, nheads=nheads,
                           compute_dtype=jnp.bfloat16))
    assert jnp.allclose(out_bf16, ref, atol=5e-2, rtol=5e-2), (
        float(jnp.max(jnp.abs(out_bf16 - ref))))

    # --- packed K/V path (key is value): fused K|V projection matmul ---------
    ref_kv = mha_nested_reference(query, key, key, params, nheads=nheads)
    out_kv = jax.block_until_ready(
        mha_nested_forward(query, key, key, params, nheads=nheads,
                           compute_dtype=jnp.float32))
    assert jnp.allclose(out_kv, ref_kv, atol=1e-4, rtol=1e-4), (
        float(jnp.max(jnp.abs(out_kv - ref_kv))))

    # --- fully packed self-attention path (query is key is value) ------------
    ref_self = mha_nested_reference(query, query, query, params, nheads=nheads)
    out_self = jax.block_until_ready(
        mha_nested_forward(query, query, query, params, nheads=nheads,
                           compute_dtype=jnp.float32))
    assert jnp.allclose(out_self, ref_self, atol=1e-4, rtol=1e-4), (
        float(jnp.max(jnp.abs(out_self - ref_self))))

    # --- optional: single-buffered grid-invariant weights (v7x VMEM saver).
    # Guarded because pipeline_mode=pl.Buffered(1) support varies by JAX release.
    out_sb = None
    try:
        out_sb = jax.block_until_ready(
            mha_nested_forward(query, key, value, params, nheads=nheads,
                               compute_dtype=jnp.float32, weight_buffers=1))
    except Exception:
        out_sb = None
    if out_sb is not None:
        assert jnp.allclose(out_sb, ref, atol=1e-4, rtol=1e-4)

    print("KERNEL_OK")
</pallas_src>

<mosaic_0001>
module attributes {stable_mosaic.version = 11 : i64} {
  func.func @_mha_kernel_general(%arg0: i32, %arg1: memref<8x32xf32, #tpu.memory_space<vmem>>, %arg2: memref<8x32xf32, #tpu.memory_space<vmem>>, %arg3: memref<8x32xf32, #tpu.memory_space<vmem>>, %arg4: memref<32x32xf32, #tpu.memory_space<vmem>>, %arg5: memref<32x32xf32, #tpu.memory_space<vmem>>, %arg6: memref<32x32xf32, #tpu.memory_space<vmem>>, %arg7: memref<32x32xf32, #tpu.memory_space<vmem>>, %arg8: memref<1x32xf32, #tpu.memory_space<vmem>>, %arg9: memref<1x32xf32, #tpu.memory_space<vmem>>, %arg10: memref<1x32xf32, #tpu.memory_space<vmem>>, %arg11: memref<1x32xf32, #tpu.memory_space<vmem>>, %arg12: memref<8x32xf32, #tpu.memory_space<vmem>>) attributes {dimension_semantics = [#tpu.dimension_semantics<parallel>], iteration_bounds = array<i64: 2>, scalar_prefetch = 0 : i64, scratch_operands = 0 : i64, tpu.core_type = #tpu.core_type<tc>, window_params = [{transform_indices = @transform_0, window_bounds = array<i64: 8, 32>}, {transform_indices = @transform_1, window_bounds = array<i64: 8, 32>}, {transform_indices = @transform_2, window_bounds = array<i64: 8, 32>}, {pipeline_mode = #tpu.pipeline_mode<synchronous>, transform_indices = @transform_3, window_bounds = array<i64: 32, 32>}, {pipeline_mode = #tpu.pipeline_mode<synchronous>, transform_indices = @transform_4, window_bounds = array<i64: 32, 32>}, {pipeline_mode = #tpu.pipeline_mode<synchronous>, transform_indices = @transform_5, window_bounds = array<i64: 32, 32>}, {pipeline_mode = #tpu.pipeline_mode<synchronous>, transform_indices = @transform_6, window_bounds = array<i64: 32, 32>}, {pipeline_mode = #tpu.pipeline_mode<synchronous>, transform_indices = @transform_7, window_bounds = array<i64: 1, 32>}, {pipeline_mode = #tpu.pipeline_mode<synchronous>, transform_indices = @transform_8, window_bounds = array<i64: 1, 32>}, {pipeline_mode = #tpu.pipeline_mode<synchronous>, transform_indices = @transform_9, window_bounds = array<i64: 1, 32>}, {pipeline_mode = #tpu.pipeline_mode<synchronous>, transform_indices = @transform_10, window_bounds = array<i64: 1, 32>}, {transform_indices = @transform_11, window_bounds = array<i64: 8, 32>}]} {
    %c0 = arith.constant 0 : index
    %c0_0 = arith.constant 0 : index
    %0 = vector.load %arg1[%c0, %c0_0] : memref<8x32xf32, #tpu.memory_space<vmem>>, vector<8x32xf32>
    %c0_1 = arith.constant 0 : index
    %c0_2 = arith.constant 0 : index
    %1 = vector.load %arg4[%c0_1, %c0_2] : memref<32x32xf32, #tpu.memory_space<vmem>>, vector<32x32xf32>
    %cst = arith.constant dense<0.000000e+00> : vector<8x32xf32>
    %2 = tpu.matmul %0, %1, %cst {dimension_numbers = #tpu.dot_dimension_numbers<[1], [0], [0], [1], [0, 0, 1, 1], [], []>} : vector<8x32xf32>, vector<32x32xf32>, vector<8x32xf32> -> vector<8x32xf32>
    %c0_3 = arith.constant 0 : index
    %c0_4 = arith.constant 0 : index
    %3 = vector.load %arg8[%c0_3, %c0_4] : memref<1x32xf32, #tpu.memory_space<vmem>>, vector<1x32xf32>
    %4 = vector.broadcast %3 : vector<1x32xf32> to vector<8x32xf32>
    %5 = arith.addf %2, %4 : vector<8x32xf32>
    %c0_5 = arith.constant 0 : index
    %c0_6 = arith.constant 0 : index
    %6 = vector.load %arg2[%c0_5, %c0_6] : memref<8x32xf32, #tpu.memory_space<vmem>>, vector<8x32xf32>
    %c0_7 = arith.constant 0 : index
    %c0_8 = arith.constant 0 : index
    %7 = vector.load %arg5[%c0_7, %c0_8] : memref<32x32xf32, #tpu.memory_space<vmem>>, vector<32x32xf32>
    %cst_9 = arith.constant dense<0.000000e+00> : vector<8x32xf32>
    %8 = tpu.matmul %6, %7, %cst_9 {dimension_numbers = #tpu.dot_dimension_numbers<[1], [0], [0], [1], [0, 0, 1, 1], [], []>} : vector<8x32xf32>, vector<32x32xf32>, vector<8x32xf32> -> vector<8x32xf32>
    %c0_10 = arith.constant 0 : index
    %c0_11 = arith.constant 0 : index
    %9 = vector.load %arg9[%c0_10, %c0_11] : memref<1x32xf32, #tpu.memory_space<vmem>>, vector<1x32xf32>
    %10 = vector.broadcast %9 : vector<1x32xf32> to vector<8x32xf32>
    %11 = arith.addf %8, %10 : vector<8x32xf32>
    %c0_12 = arith.constant 0 : index
    %c0_13 = arith.constant 0 : index
    %12 = vector.load %arg3[%c0_12, %c0_13] : memref<8x32xf32, #tpu.memory_space<vmem>>, vector<8x32xf32>
    %c0_14 = arith.constant 0 : index
    %c0_15 = arith.constant 0 : index
    %13 = vector.load %arg6[%c0_14, %c0_15] : memref<32x32xf32, #tpu.memory_space<vmem>>, vector<32x32xf32>
    %cst_16 = arith.constant dense<0.000000e+00> : vector<8x32xf32>
    %14 = tpu.matmul %12, %13, %cst_16 {dimension_numbers = #tpu.dot_dimension_numbers<[1], [0], [0], [1], [0, 0, 1, 1], [], []>} : vector<8x32xf32>, vector<32x32xf32>, vector<8x32xf32> -> vector<8x32xf32>
    %c0_17 = arith.constant 0 : index
    %c0_18 = arith.constant 0 : index
    %15 = vector.load %arg10[%c0_17, %c0_18] : memref<1x32xf32, #tpu.memory_space<vmem>>, vector<1x32xf32>
    %16 = vector.broadcast %15 : vector<1x32xf32> to vector<8x32xf32>
    %17 = arith.addf %14, %16 : vector<8x32xf32>
    %18 = vector.shape_cast %5 : vector<8x32xf32> to vector<1x8x32xf32>
    %19 = vector.shape_cast %11 : vector<8x32xf32> to vector<1x8x32xf32>
    %20 = vector.shape_cast %17 : vector<8x32xf32> to vector<1x8x32xf32>
    %21 = vector.extract_strided_slice %18 {offsets = [0, 0, 0], sizes = [1, 8, 8], strides = [1, 1, 1]} : vector<1x8x32xf32> to vector<1x8x8xf32>
    %22 = vector.extract_strided_slice %19 {offsets = [0, 0, 0], sizes = [1, 8, 8], strides = [1, 1, 1]} : vector<1x8x32xf32> to vector<1x8x8xf32>
    "tpu.trace_start"() <{level = 10 : i32, message = "nqd,nkd->nqk"}> : () -> ()
    %cst_19 = arith.constant dense<0.000000e+00> : vector<1x8x8xf32>
    %23 = tpu.matmul %21, %22, %cst_19 {dimension_numbers = #tpu.dot_dimension_numbers<[2], [2], [1], [1], [0, 0, 0, 1, 1, 1], [0], [0]>} : vector<1x8x8xf32>, vector<1x8x8xf32>, vector<1x8x8xf32> -> vector<1x8x8xf32>
    "tpu.trace_stop"() : () -> ()
    %cst_20 = arith.constant dense<0xFF800000> : vector<1x8xf32>
    %24 = vector.multi_reduction <maximumf>, %23, %cst_20 [2] : vector<1x8x8xf32> to vector<1x8xf32>
    %25 = vector.shape_cast %24 : vector<1x8xf32> to vector<1x8x1xf32>
    %26 = vector.broadcast %25 : vector<1x8x1xf32> to vector<1x8x8xf32>
    %27 = arith.subf %23, %26 : vector<1x8x8xf32>
    %28 = math.exp %27 : vector<1x8x8xf32>
    %cst_21 = arith.constant dense<0.000000e+00> : vector<1x8xf32>
    %29 = vector.multi_reduction <add>, %28, %cst_21 [2] : vector<1x8x8xf32> to vector<1x8xf32>
    %30 = vector.shape_cast %29 : vector<1x8xf32> to vector<1x8x1xf32>
    %31 = tpu.reciprocal %30 : vector<1x8x1xf32> -> vector<1x8x1xf32>
    %32 = vector.broadcast %31 : vector<1x8x1xf32> to vector<1x8x8xf32>
    %33 = arith.mulf %28, %32 : vector<1x8x8xf32>
    %34 = vector.extract_strided_slice %20 {offsets = [0, 0, 0], sizes = [1, 8, 8], strides = [1, 1, 1]} : vector<1x8x32xf32> to vector<1x8x8xf32>
    "tpu.trace_start"() <{level = 10 : i32, message = "nqk,nkd->nqd"}> : () -> ()
    %cst_22 = arith.constant dense<0.000000e+00> : vector<1x8x8xf32>
    %35 = tpu.matmul %33, %34, %cst_22 {dimension_numbers = #tpu.dot_dimension_numbers<[2], [1], [1], [2], [0, 0, 0, 1, 1, 2], [0], [0]>} : vector<1x8x8xf32>, vector<1x8x8xf32>, vector<1x8x8xf32> -> vector<1x8x8xf32>
    "tpu.trace_stop"() : () -> ()
    %36 = vector.shape_cast %35 : vector<1x8x8xf32> to vector<8x8xf32>
    %37 = vector.extract_strided_slice %18 {offsets = [0, 0, 8], sizes = [1, 8, 8], strides = [1, 1, 1]} : vector<1x8x32xf32> to vector<1x8x8xf32>
    %38 = vector.extract_strided_slice %19 {offsets = [0, 0, 8], sizes = [1, 8, 8], strides = [1, 1, 1]} : vector<1x8x32xf32> to vector<1x8x8xf32>
    "tpu.trace_start"() <{level = 10 : i32, message = "nqd,nkd->nqk"}> : () -> ()
    %cst_23 = arith.constant dense<0.000000e+00> : vector<1x8x8xf32>
    %39 = tpu.matmul %37, %38, %cst_23 {dimension_numbers = #tpu.dot_dimension_numbers<[2], [2], [1], [1], [0, 0, 0, 1, 1, 1], [0], [0]>} : vector<1x8x8xf32>, vector<1x8x8xf32>, vector<1x8x8xf32> -> vector<1x8x8xf32>
    "tpu.trace_stop"() : () -> ()
    %cst_24 = arith.constant dense<0xFF800000> : vector<1x8xf32>
    %40 = vector.multi_reduction <maximumf>, %39, %cst_24 [2] : vector<1x8x8xf32> to vector<1x8xf32>
    %41 = vector.shape_cast %40 : vector<1x8xf32> to vector<1x8x1xf32>
    %42 = vector.broadcast %41 : vector<1x8x1xf32> to vector<1x8x8xf32>
    %43 = arith.subf %39, %42 : vector<1x8x8xf32>
    %44 = math.exp %43 : vector<1x8x8xf32>
    %cst_25 = arith.constant dense<0.000000e+00> : vector<1x8xf32>
    %45 = vector.multi_reduction <add>, %44, %cst_25 [2] : vector<1x8x8xf32> to vector<1x8xf32>
    %46 = vector.shape_cast %45 : vector<1x8xf32> to vector<1x8x1xf32>
    %47 = tpu.reciprocal %46 : vector<1x8x1xf32> -> vector<1x8x1xf32>
    %48 = vector.broadcast %47 : vector<1x8x1xf32> to vector<1x8x8xf32>
    %49 = arith.mulf %44, %48 : vector<1x8x8xf32>
    %50 = vector.extract_strided_slice %20 {offsets = [0, 0, 8], sizes = [1, 8, 8], strides = [1, 1, 1]} : vector<1x8x32xf32> to vector<1x8x8xf32>
    "tpu.trace_start"() <{level = 10 : i32, message = "nqk,nkd->nqd"}> : () -> ()
    %cst_26 = arith.constant dense<0.000000e+00> : vector<1x8x8xf32>
    %51 = tpu.matmul %49, %50, %cst_26 {dimension_numbers = #tpu.dot_dimension_numbers<[2], [1], [1], [2], [0, 0, 0, 1, 1, 2], [0], [0]>} : vector<1x8x8xf32>, vector<1x8x8xf32>, vector<1x8x8xf32> -> vector<1x8x8xf32>
    "tpu.trace_stop"() : () -> ()
    %52 = vector.shape_cast %51 : vector<1x8x8xf32> to vector<8x8xf32>
    %53 = vector.extract_strided_slice %18 {offsets = [0, 0, 16], sizes = [1, 8, 8], strides = [1, 1, 1]} : vector<1x8x32xf32> to vector<1x8x8xf32>
    %54 = vector.extract_strided_slice %19 {offsets = [0, 0, 16], sizes = [1, 8, 8], strides = [1, 1, 1]} : vector<1x8x32xf32> to vector<1x8x8xf32>
    "tpu.trace_start"() <{level = 10 : i32, message = "nqd,nkd->nqk"}> : () -> ()
    %cst_27 = arith.constant dense<0.000000e+00> : vector<1x8x8xf32>
    %55 = tpu.matmul %53, %54, %cst_27 {dimension_numbers = #tpu.dot_dimension_numbers<[2], [2], [1], [1], [0, 0, 0, 1, 1, 1], [0], [0]>} : vector<1x8x8xf32>, vector<1x8x8xf32>, vector<1x8x8xf32> -> vector<1x8x8xf32>
    "tpu.trace_stop"() : () -> ()
    %cst_28 = arith.constant dense<0xFF800000> : vector<1x8xf32>
    %56 = vector.multi_reduction <maximumf>, %55, %cst_28 [2] : vector<1x8x8xf32> to vector<1x8xf32>
    %57 = vector.shape_cast %56 : vector<1x8xf32> to vector<1x8x1xf32>
    %58 = vector.broadcast %57 : vector<1x8x1xf32> to vector<1x8x8xf32>
    %59 = arith.subf %55, %58 : vector<1x8x8xf32>
    %60 = math.exp %59 : vector<1x8x8xf32>
    %cst_29 = arith.constant dense<0.000000e+00> : vector<1x8xf32>
    %61 = vector.multi_reduction <add>, %60, %cst_29 [2] : vector<1x8x8xf32> to vector<1x8xf32>
    %62 = vector.shape_cast %61 : vector<1x8xf32> to vector<1x8x1xf32>
    %63 = tpu.reciprocal %62 : vector<1x8x1xf32> -> vector<1x8x1xf32>
    %64 = vector.broadcast %63 : vector<1x8x1xf32> to vector<1x8x8xf32>
    %65 = arith.mulf %60, %64 : vector<1x8x8xf32>
    %66 = vector.extract_strided_slice %20 {offsets = [0, 0, 16], sizes = [1, 8, 8], strides = [1, 1, 1]} : vector<1x8x32xf32> to vector<1x8x8xf32>
    "tpu.trace_start"() <{level = 10 : i32, message = "nqk,nkd->nqd"}> : () -> ()
    %cst_30 = arith.constant dense<0.000000e+00> : vector<1x8x8xf32>
    %67 = tpu.matmul %65, %66, %cst_30 {dimension_numbers = #tpu.dot_dimension_numbers<[2], [1], [1], [2], [0, 0, 0, 1, 1, 2], [0], [0]>} : vector<1x8x8xf32>, vector<1x8x8xf32>, vector<1x8x8xf32> -> vector<1x8x8xf32>
    "tpu.trace_stop"() : () -> ()
    %68 = vector.shape_cast %67 : vector<1x8x8xf32> to vector<8x8xf32>
    %69 = vector.extract_strided_slice %18 {offsets = [0, 0, 24], sizes = [1, 8, 8], strides = [1, 1, 1]} : vector<1x8x32xf32> to vector<1x8x8xf32>
    %70 = vector.extract_strided_slice %19 {offsets = [0, 0, 24], sizes = [1, 8, 8], strides = [1, 1, 1]} : vector<1x8x32xf32> to vector<1x8x8xf32>
    "tpu.trace_start"() <{level = 10 : i32, message = "nqd,nkd->nqk"}> : () -> ()
    %cst_31 = arith.constant dense<0.000000e+00> : vector<1x8x8xf32>
    %71 = tpu.matmul %69, %70, %cst_31 {dimension_numbers = #tpu.dot_dimension_numbers<[2], [2], [1], [1], [0, 0, 0, 1, 1, 1], [0], [0]>} : vector<1x8x8xf32>, vector<1x8x8xf32>, vector<1x8x8xf32> -> vector<1x8x8xf32>
    "tpu.trace_stop"() : () -> ()
    %cst_32 = arith.constant dense<0xFF800000> : vector<1x8xf32>
    %72 = vector.multi_reduction <maximumf>, %71, %cst_32 [2] : vector<1x8x8xf32> to vector<1x8xf32>
    %73 = vector.shape_cast %72 : vector<1x8xf32> to vector<1x8x1xf32>
    %74 = vector.broadcast %73 : vector<1x8x1xf32> to vector<1x8x8xf32>
    %75 = arith.subf %71, %74 : vector<1x8x8xf32>
    %76 = math.exp %75 : vector<1x8x8xf32>
    %cst_33 = arith.constant dense<0.000000e+00> : vector<1x8xf32>
    %77 = vector.multi_reduction <add>, %76, %cst_33 [2] : vector<1x8x8xf32> to vector<1x8xf32>
    %78 = vector.shape_cast %77 : vector<1x8xf32> to vector<1x8x1xf32>
    %79 = tpu.reciprocal %78 : vector<1x8x1xf32> -> vector<1x8x1xf32>
    %80 = vector.broadcast %79 : vector<1x8x1xf32> to vector<1x8x8xf32>
    %81 = arith.mulf %76, %80 : vector<1x8x8xf32>
    %82 = vector.extract_strided_slice %20 {offsets = [0, 0, 24], sizes = [1, 8, 8], strides = [1, 1, 1]} : vector<1x8x32xf32> to vector<1x8x8xf32>
    "tpu.trace_start"() <{level = 10 : i32, message = "nqk,nkd->nqd"}> : () -> ()
    %cst_34 = arith.constant dense<0.000000e+00> : vector<1x8x8xf32>
    %83 = tpu.matmul %81, %82, %cst_34 {dimension_numbers = #tpu.dot_dimension_numbers<[2], [1], [1], [2], [0, 0, 0, 1, 1, 2], [0], [0]>} : vector<1x8x8xf32>, vector<1x8x8xf32>, vector<1x8x8xf32> -> vector<1x8x8xf32>
    "tpu.trace_stop"() : () -> ()
    %84 = vector.shape_cast %83 : vector<1x8x8xf32> to vector<8x8xf32>
    %85 = tpu.concatenate %36, %52, %68, %84 in 1 : vector<8x8xf32>, vector<8x8xf32>, vector<8x8xf32>, vector<8x8xf32> -> vector<8x32xf32>
    %c0_35 = arith.constant 0 : index
    %c0_36 = arith.constant 0 : index
    %86 = vector.load %arg7[%c0_35, %c0_36] : memref<32x32xf32, #tpu.memory_space<vmem>>, vector<32x32xf32>
    %cst_37 = arith.constant dense<0.000000e+00> : vector<8x32xf32>
    %87 = tpu.matmul %85, %86, %cst_37 {dimension_numbers = #tpu.dot_dimension_numbers<[1], [0], [0], [1], [0, 0, 1, 1], [], []>} : vector<8x32xf32>, vector<32x32xf32>, vector<8x32xf32> -> vector<8x32xf32>
    %c0_38 = arith.constant 0 : index
    %c0_39 = arith.constant 0 : index
    %88 = vector.load %arg11[%c0_38, %c0_39] : memref<1x32xf32, #tpu.memory_space<vmem>>, vector<1x32xf32>
    %89 = vector.broadcast %88 : vector<1x32xf32> to vector<8x32xf32>
    %90 = arith.addf %87, %89 : vector<8x32xf32>
    %c0_40 = arith.constant 0 : index
    %c0_41 = arith.constant 0 : index
    %91 = vector.load %arg12[%c0_40, %c0_41] : memref<8x32xf32, #tpu.memory_space<vmem>>, vector<8x32xf32>
    tpu.vector_store %arg12[%c0_40, %c0_41], %90 {strides = array<i32>} : memref<8x32xf32, #tpu.memory_space<vmem>>, vector<8x32xf32>,
    return
  }
  func.func @transform_0(%arg0: i32) -> (i32, i32) {
    %c0_i32 = arith.constant 0 : i32
    %c0_i32_0 = arith.constant 0 : i32
    return %arg0, %c0_i32 : i32, i32
  }
  func.func @transform_1(%arg0: i32) -> (i32, i32) {
    %c0_i32 = arith.constant 0 : i32
    %c0_i32_0 = arith.constant 0 : i32
    return %arg0, %c0_i32 : i32, i32
  }
  func.func @transform_2(%arg0: i32) -> (i32, i32) {
    %c0_i32 = arith.constant 0 : i32
    %c0_i32_0 = arith.constant 0 : i32
    return %arg0, %c0_i32 : i32, i32
  }
  func.func @transform_3(%arg0: i32) -> (i32, i32) {
    %c0_i32 = arith.constant 0 : i32
    %c0_i32_0 = arith.constant 0 : i32
    %c0_i32_1 = arith.constant 0 : i32
    return %c0_i32, %c0_i32_0 : i32, i32
  }
  func.func @transform_4(%arg0: i32) -> (i32, i32) {
    %c0_i32 = arith.constant 0 : i32
    %c0_i32_0 = arith.constant 0 : i32
    %c0_i32_1 = arith.constant 0 : i32
    return %c0_i32, %c0_i32_0 : i32, i32
  }
  func.func @transform_5(%arg0: i32) -> (i32, i32) {
    %c0_i32 = arith.constant 0 : i32
    %c0_i32_0 = arith.constant 0 : i32
    %c0_i32_1 = arith.constant 0 : i32
    return %c0_i32, %c0_i32_0 : i32, i32
  }
  func.func @transform_6(%arg0: i32) -> (i32, i32) {
    %c0_i32 = arith.constant 0 : i32
    %c0_i32_0 = arith.constant 0 : i32
    %c0_i32_1 = arith.constant 0 : i32
    return %c0_i32, %c0_i32_0 : i32, i32
  }
  func.func @transform_7(%arg0: i32) -> (i32, i32) {
    %c0_i32 = arith.constant 0 : i32
    %c0_i32_0 = arith.constant 0 : i32
    %c0_i32_1 = arith.constant 0 : i32
    return %c0_i32, %c0_i32_0 : i32, i32
  }
  func.func @transform_8(%arg0: i32) -> (i32, i32) {
    %c0_i32 = arith.constant 0 : i32
    %c0_i32_0 = arith.constant 0 : i32
    %c0_i32_1 = arith.constant 0 : i32
    return %c0_i32, %c0_i32_0 : i32, i32
  }
  func.func @transform_9(%arg0: i32) -> (i32, i32) {
    %c0_i32 = arith.constant 0 : i32
    %c0_i32_0 = arith.constant 0 : i32
    %c0_i32_1 = arith.constant 0 : i32
    return %c0_i32, %c0_i32_0 : i32, i32
  }
  func.func @transform_10(%arg0: i32) -> (i32, i32) {
    %c0_i32 = arith.constant 0 : i32
    %c0_i32_0 = arith.constant 0 : i32
    %c0_i32_1 = arith.constant 0 : i32
    return %c0_i32, %c0_i32_0 : i32, i32
  }
  func.func @transform_11(%arg0: i32) -> (i32, i32) {
    %c0_i32 = arith.constant 0 : i32
    %c0_i32_0 = arith.constant 0 : i32
    return %arg0, %c0_i32 : i32, i32
  }
}

</mosaic_0001>

<bundles_post_ra>
// kernel: tpu_custom_call.1
= control target key start
LH: loop header
LB: loop body
LE: loop exit
PB: predicated region body
PF: predicated region fallthrough
CT: control target
= control target key end

     0   :  { %s1991_s0 = inlined_call_operand.hbm [shape: f32[16,32], index: 0, kind: input, shape index: {}]   ;;  %s1992_s1 = inlined_call_operand.hbm [shape: f32[16,32], index: 1, kind: input, shape index: {}]   ;;  %s1993_s2 = inlined_call_operand.hbm [shape: f32[16,32], index: 2, kind: input, shape index: {}]   ;;  %s1994_s3 = inlined_call_operand.hbm [shape: f32[32,32], index: 3, kind: input, shape index: {}]   ;;  %s1995_s4 = inlined_call_operand.hbm [shape: f32[32,32], index: 4, kind: input, shape index: {}]   ;;  %s1996_s5 = inlined_call_operand.hbm [shape: f32[32,32], index: 5, kind: input, shape index: {}]   ;;  %s1997_s6 = inlined_call_operand.hbm [shape: f32[32,32], index: 6, kind: input, shape index: {}]   ;;  %s1998_s7 = inlined_call_operand.vmem [shape: f32[1,32], index: 7, kind: input, shape index: {}]   ;;  %s1999_s8 = inlined_call_operand.vmem [shape: f32[1,32], index: 8, kind: input, shape index: {}]   ;;  %s2000_s9 = inlined_call_operand.vmem [shape: f32[1,32], index: 9, kind: input, shape index: {}]   ;;  %s2001_s10 = inlined_call_operand.vmem [shape: f32[1,32], index: 10, kind: input, shape index: {}]   ;;  %s2002_s11 = inlined_call_operand.hbm [shape: f32[16,32], index: 11, kind: output, shape index: {}]  }
   0x1   :  { %2014 = sst [smem:[#allocation25_spill]] %s1992_s1 }
   0x2   :  { %2015 = sst [smem:[#allocation26_spill]] %s1994_s3 }
   0x3   :  { %2016 = sst [smem:[#allocation27_spill]] %s1995_s4 }
   0x4   :  { %2017 = sst [smem:[#allocation28_spill]] %s1996_s5 }
   0x5   :  { %2018 = sst [smem:[#allocation29_spill]] %s1997_s6 }
   0x6   :  { %2019 = sst [smem:[#allocation30_spill]] %s2001_s10 }
   0x7   :  { %16 = vsyncpa [#allocation3], 0 }
   0x8   :  { %18 = vsyncpa [#allocation3 + $0x1], 0 }
   0x9   :  { %19 = vsyncpa [#allocation6], 0 }
   0xa   :  { %21 = vsyncpa [#allocation6 + $0x1], 0 }
   0xb   :  { %22 = vsyncpa [#allocation9], 0 }
   0xc   :  { %23 = vsyncpa [#allocation12], 0 }
   0xd   :  { %24 = vsyncpa [#allocation4], 0 }
   0xe   :  { %26 = vsyncpa [#allocation4 + $0x1], 0  ;;  %s1696_s17 = smov 0   ;;  %s1698_s18 = smov 0  }
   0xf   :  { %s1700_s19 = smov 0   ;;  %s1702_s20 = smov 0  }
  0x10 LB: > { %2020 = sst [smem:[#allocation20_spill]] %s1610_s17  ;;  %s1720_s24 = sadd.s32 4294967295, %s1622_s20   ;;  %s1622_s20 = sphi %s1702_s20, %s2048_s20   ;;  %s1618_s19 = sphi %s1700_s19, %s2052_s19   ;;  %s1614_s18 = sphi %s1698_s18, %s2051_s18   ;;  %s1610_s17 = sphi %s1696_s17, %s2050_s17  }
  0x11   : > { %2021 = sst [smem:[#allocation21_spill]] %s1622_s20  ;;  %p1168_p0 = scmp.ge.s32.totalorder %s1622_s20, 1 }
  0x12   : > { %s2022_s3 = sld [smem:[#allocation26_spill]]  ;;  %p2013_p1 = scmp.eq.s32.totalorder %s1720_s24, 0 }
  0x13   : > { %p309_p2 = scmp.lt.s32.totalorder %s1622_s20, 3  ;;  %s1624_s26 = smov [#allocation8]  }
  0x14   : > { %s322_s27 = sshll.u32 %s1624_s26, 4  ;;  %s2024_s5 = sld [smem:[#allocation28_spill]]  ;;  %s323_s27 = int_to_ptr.vmem [resolvable:$true] %s322_s27 }
  0x15   : > { %p1725_p3 = pnand %p1168_p0, %p309_p2  ;;  %s1625_s13 = smov [#allocation11]  }
  0x16   : > { %s350_s14 = sshll.u32 %s1625_s13, 4  ;;  %s2003_s15 = smov 128   ;;  %s351_s14 = int_to_ptr.vmem [resolvable:$true] %s350_s14 }
  0x17   : > { %p1233_p4 = pneg %p1725_p3  ;;  %s2005_s16 = smov 8  }
  0x18   : > { %s320_s23 = sshll.u32 %s2022_s3, 4  ;;  %s1167_s21 = sadd.s32 4294967294, %s1622_s20   ;;  %s321_s23 = int_to_ptr.hbm [resolvable:$true] %s320_s23 }
  0x19   : > { %p1737_p6 = pnand %p1233_p4, %p2013_p1  ;;  %s1753_s22 = sadd.s32 1, %s1622_s20  }
  0x1a   : > { %s348_s30 = sshll.u32 %s2024_s5, 4  ;;  %2026 = sst [smem:[#allocation22_spill]] %s1753_s22  ;;  %s349_s30 = int_to_ptr.hbm [resolvable:$true] %s348_s30 }
  0x1b   : > { %1236 = dma.hbm_to_vmem [thread:$0]  (!%p1737_p6), %s321_s23, 512, %s323_s27, [#allocation9], %s2003_s15, %s2003_s15, %s2005_s16  }
  0x1c   : > { %1242 = dma.hbm_to_vmem [thread:$0]  (!%p1737_p6), %s349_s30, 512, %s351_s14, [#allocation12], %s2003_s15, %s2003_s15, %s2005_s16  }
  0x1d   : > { %s36_s26 = ssub.s32 %s1622_s20, %s1753_s22  ;;  %s39_s28 = sadd.s32 1, %s1618_s19 }
  0x1e   : > { %p37_p7 = scmp.eq.s32.totalorder %s36_s26, 0  ;;  %p46_p8 = scmp.ne.s32.totalorder %s1618_s19, %s1614_s18 }
  0x1f   : > { %p47_p9 = scmp.eq.s32.totalorder %s1622_s20, 0  ;;  %p52_p10 = scmp.ne.s32.totalorder %s1614_s18, %s1610_s17 }
  0x20   : > { %s1764_s23 = scalar_select %p37_p7, %s1618_s19, %s39_s28  }
  0x21   : > { %p48_p11 = por %p47_p9, %p46_p8  ;;  %p1768_p12 = por %p2013_p1, %p52_p10 }
  0x22   : > { %2027 = sst [smem:[#allocation23_spill]] %s1764_s23  ;;  %p296_p13 = scmp.eq.s32.totalorder %s1720_s24, 1 }
  0x23   : > { %p302_p0 = scmp.eq.s32.totalorder %s1167_s21, 1  ;;  %p1264_p2 = scmp.lt.s32.totalorder %s1622_s20, 2 }
  0x24   : > { %s2009_s29 = sand.u32 1, %s1618_s19   ;;  %p1775_p4 = por %p296_p13, %p46_p8 }
  0x25   : > { %p1779_p5 = por %p302_p0, %p52_p10  ;;  %s1785_s14 = sshll.u32 %s2009_s29, 3 }
  0x26   : > { %s1788_s26 = sshll.u32 %s1622_s20, 3  ;;  %p1790_p7 = pnand %p1264_p2, %p48_p11 }
  0x27   : > { %s2030_s13 = scalar_select %p1779_p5, 1, 0 }
  0x28   : > { %s409_s21 = sand.u32 1, %s1622_s20   ;;  %s2033_s1 = sld [smem:[#allocation25_spill]] }
  0x29   : > { %2031 = sst [smem:[#allocation24_spill]] %s2030_s13  ;;  %s413_s23 = scalar_lea.vmem [#allocation5], %s1785_s14 }
  0x2a   : > { %s421_s22 = sshll.u32 %s413_s23, 4  ;;  %s1800_s29 = scalar_lea.sflag [#allocation6], %s409_s21  ;;  %s422_s22 = int_to_ptr.vmem [resolvable:$true] %s421_s22 }
  0x2b   : > { %p1398_p9 = pneg %p1790_p7 }
  0x2e   : > { %s417_s3 = scalar_lea.hbm %s2033_s1, %s1788_s26 }
  0x2f   : > { %s419_s5 = sshll.u32 %s417_s3, 4  ;;  %s1401_s3 = scalar_lea.hbm %s2033_s1, 16  ;;  %s420_s5 = int_to_ptr.hbm [resolvable:$true] %s419_s5 }
  0x30   : > { %s1394_s13 = sshra.s32 %s420_s5, 4  ;;  %s1395_s13 = int_to_ptr.hbm [resolvable:$true] %s1394_s13 }
  0x31   : > { %s1396_s17 = scalar_lea.hbm %s1395_s13, 8  ;;  %p1402_p13 = scmp.lt.s32.totalorder %s1395_s13, %s2033_s1 }
  0x32   : > { %p1397_p8 = scmp.ne.s32.totalorder %s1395_s13, %s1396_s17  ;;  %p1403_p0 = scmp.lt.s32.totalorder %s1401_s3, %s1396_s17 }
  0x34   : > { %p1399_p10 = pnand %p1398_p9, %p1397_p8  ;;  %p1404_p2 = por %p1403_p0, %p1402_p13 }
  0x36   : > { %p1400_p11 = pneg %p1399_p10 }
  0x38   : > { %p1405_p1 = pnand %p1404_p2, %p1400_p11 }
  0x3a   : > { %1408 = shalt.err (!%p1405_p1)
}
  0x3b   : > { %1252 = dma.hbm_to_vmem [thread:$0]  (!%p1790_p7), %s420_s5, 128, %s422_s22, %s1800_s29  }
  0x3c   : > { %s2034_s4 = sld [smem:[#allocation27_spill]]  ;;  %s1628_s15 = smov [#allocation10]  }
  0x3d   : > { %s336_s13 = sshll.u32 %s1628_s15, 4  ;;  %s2035_s6 = sld [smem:[#allocation29_spill]]  ;;  %s337_s13 = int_to_ptr.vmem [resolvable:$true] %s336_s13 }
  0x3e   : > { %s2036_s23 = smov 8   ;;  %s2037_s1 = smov 128  }
  0x3f   : > { %s1629_s5 = smov [#allocation13]   ;;  %s398_s15 = scalar_lea.hbm %s1991_s0, %s1788_s26 }
  0x40   : > { %s364_s22 = sshll.u32 %s1629_s5, 4  ;;  %s394_s17 = scalar_lea.vmem [#allocation2], %s1785_s14  ;;  %s365_s22 = int_to_ptr.vmem [resolvable:$true] %s364_s22 }
  0x41   : > { %s402_s3 = sshll.u32 %s394_s17, 4  ;;  %s403_s3 = int_to_ptr.vmem [resolvable:$true] %s402_s3 }
  0x42   : > { %s334_s20 = sshll.u32 %s2034_s4, 4  ;;  %s400_s4 = sshll.u32 %s398_s15, 4  ;;  %s335_s20 = int_to_ptr.hbm [resolvable:$true] %s334_s20  ;;  %s401_s4 = int_to_ptr.hbm [resolvable:$true] %s400_s4 }
  0x43   : > { %s362_s16 = sshll.u32 %s2035_s6, 4  ;;  %s1484_s6 = sshra.s32 %s401_s4, 4  ;;  %s363_s16 = int_to_ptr.hbm [resolvable:$true] %s362_s16  ;;  %s1485_s6 = int_to_ptr.hbm [resolvable:$true] %s1484_s6 }
  0x44   : > { %1239 = dma.hbm_to_vmem [thread:$0]  (!%p1737_p6), %s335_s20, 512, %s337_s13, [#allocation9], %s2037_s1, %s2037_s1, %s2036_s23  }
  0x45   : > { %1245 = dma.hbm_to_vmem [thread:$0]  (!%p1737_p6), %s363_s16, 512, %s365_s22, [#allocation12], %s2037_s1, %s2037_s1, %s2036_s23  }
  0x46   : > { %s2038_s20 = sand.u32 1, %s1618_s19   ;;  %s1486_s5 = scalar_lea.hbm %s1485_s6, 8 }
  0x47   : > { %s391_s13 = scalar_lea.sflag [#allocation3], %s2038_s20  ;;  %p1487_p1 = scmp.ne.s32.totalorder %s1485_s6, %s1486_s5 }
  0x48   : > { %s1491_s16 = scalar_lea.hbm %s1991_s0, 16  ;;  %p1492_p6 = scmp.lt.s32.totalorder %s1485_s6, %s1991_s0 }
  0x49   : > { %p1489_p8 = pnand %p1487_p1, %p1398_p9  ;;  %p1493_p11 = scmp.lt.s32.totalorder %s1491_s16, %s1486_s5 }
  0x4b   : > { %p1490_p10 = pneg %p1489_p8  ;;  %p1494_p13 = por %p1493_p11, %p1492_p6 }
  0x4d   : > { %p1495_p0 = pnand %p1494_p13, %p1490_p10 }
  0x4f   : > { %1498 = shalt.err (!%p1495_p0)
}
  0x50   : > { %1249 = dma.hbm_to_vmem [thread:$0]  (!%p1790_p7), %s401_s4, 128, %s403_s3, %s391_s13  }
  0x51   : > { %s436_s15 = scalar_lea.hbm %s1993_s2, %s1788_s26  ;;  %s432_s17 = scalar_lea.vmem [#allocation7], %s1785_s14 }
  0x52   : > { %s440_s20 = sshll.u32 %s432_s17, 4  ;;  %s438_s1 = sshll.u32 %s436_s15, 4  ;;  %s441_s20 = int_to_ptr.vmem [resolvable:$true] %s440_s20  ;;  %s439_s1 = int_to_ptr.hbm [resolvable:$true] %s438_s1 }
  0x53   : > { %s1514_s6 = sshra.s32 %s439_s1, 4  ;;  %s1521_s4 = scalar_lea.hbm %s1993_s2, 16  ;;  %s1515_s6 = int_to_ptr.hbm [resolvable:$true] %s1514_s6 }
  0x54   : > { %s1516_s5 = scalar_lea.hbm %s1515_s6, 8  ;;  %p1522_p10 = scmp.lt.s32.totalorder %s1515_s6, %s1993_s2 }
  0x55   : > { %p1517_p2 = scmp.ne.s32.totalorder %s1515_s6, %s1516_s5  ;;  %p1523_p6 = scmp.lt.s32.totalorder %s1521_s4, %s1516_s5 }
  0x57   : > { %p1519_p1 = pnand %p1517_p2, %p1398_p9  ;;  %p1524_p11 = por %p1523_p6, %p1522_p10 }
  0x59   : > { %p1520_p8 = pneg %p1519_p1 }
  0x5b   : > { %p1525_p13 = pnand %p1524_p11, %p1520_p8 }
  0x5d   : > { %1528 = shalt.err (!%p1525_p13)
}
  0x5e   : > { %1255 = dma.hbm_to_vmem [thread:$0]  (!%p1790_p7), %s439_s1, 128, %s441_s20, %s1800_s29  }
  0x5f   : > { %449 = sbr.rel (%p1725_p3) target bundleno = 1152 (0x480), region = 64  ;;  %s1870_s14 = sand.u32 (!%p1725_p3), 1, %s1614_s18  }
  0x60   : > { %s1873_s26 = sshll.u32 (!%p1725_p3), %s1870_s14, 3  ;;  %s452_s23 = scalar_lea.sflag (!%p1725_p3), [#allocation3], %s1870_s14 }
  0x61   : > { %s455_s22 = scalar_lea.vmem (!%p1725_p3), [#allocation2], %s1873_s26 }
  0x64   : > { %1589 = dma.done.wait (%p1768_p12), %s452_s23, 128  }
  0x65   : > { %1591 = vsyncadd (%p1768_p12), %s452_s23, 4294967168  ;;  %s461_s25 = sand.u32 1, %s1720_s24   ;;  %s465_s28 = scalar_lea.vmem [#allocation5], %s1873_s26 }
  0x66   : > { %s462_s29 = scalar_lea.sflag [#allocation6], %s461_s25 }
  0x67   : > { %1593 = dma.done.wait (%p1768_p12), %s462_s29, 256  }
  0x68   : > { %1595 = vsyncadd (%p1768_p12), %s462_s29, 4294967040  ;;  %s475_s10 = scalar_lea.vmem [#allocation7], %s1873_s26  ;;  %p2039_p3 = scmp.eq.s32.totalorder %s1720_s24, 0 }
  0x6a   : > { %1597 = dma.done.wait (%p2039_p3), [#allocation9], 1024   ;;  %p2040_p7 = pmov %p2039_p3 }
  0x6b   : > { %p2041_p9 = pmov %p2039_p3 }
  0x6c   : > { %1599 = vsyncadd (%p2040_p7), [#allocation9], 4294966272 }
  0x6d   : > { %1601 = dma.done.wait (%p2041_p9), [#allocation12], 1024   ;;  %p2042_p0 = pmov %p2039_p3 }
  0x6e   : > { %v582_v0 = vld [vmem:[#allocation10 + $0x18] sm:$0xff]  ;;  %v581_v1 = vld [vmem:[#allocation10 + $0x10] sm:$0xff]  ;;  %v580_v4 = vld [vmem:[#allocation10 + $0x8] sm:$0xff]  ;;  %vm554_vm0 = vcmask 261120   ;;  %vm642_vm1 = vcmask 64512   ;;  %s1630_s20 = smov 104  }
  0x6f   : > { %1603 = vsyncadd (%p2042_p0), [#allocation12], 4294966272  ;;  %v549_v2 = vld [vmem:[#allocation8 + $0x18] sm:$0xff]  ;;  %602 = vmatpush.msra.mxu1 %v582_v0  ;;  %v548_v3 = vld [vmem:[#allocation8 + $0x10] sm:$0xff]  ;;  %s1631_s1 = smov 120   ;;  %s1632_s6 = smov 112  }
  0x70   : > { %570 = vmatpush.msra.mxu0 %v549_v2  ;;  %v547_v5 = vld [vmem:[#allocation8 + $0x8] sm:$0xff]  ;;  %v579_v6 = vld [vmem:[#allocation10] sm:$0xff]  ;;  %v545_v9 = vld [vmem:[%s455_s22] sm:$0xff]  ;;  %s1633_s16 = smov 8   ;;  %s1634_s4 = smov 16  }
  0x71   : > { %603 = vmatpush.msra.mxu1 %v581_v1  ;;  %v546_v7 = vld [vmem:[#allocation8] sm:$0xff]  ;;  %v1314_v10 = vld [vmem:[%s1999_s8] ss:$0 sm:$0xff]  ;;  %v614_v16 = vld [vmem:[#allocation11 + $0x18] sm:$0xff]  ;;  %s1635_s3 = smov 24   ;;  %s1206_s13 = sshll.u32 %s1720_s24, 3 }
  0x72   : > { %571 = vmatpush.msra.mxu0 %v548_v3  ;;  %v578_v8 = vld [vmem:[%s465_s28] sm:$0xff]  ;;  %v1315_v11 = vld [vmem:[%s1998_s7] ss:$0 sm:$0xff]  ;;  %634 = vmatpush.msra.mxu2 %v614_v16  ;;  %s1011_s25 = scalar_lea.hbm %s2002_s11, %s1206_s13  ;;  %s544_s27 = scalar_lea.vmem [#allocation14], %s1873_s26 }
  0x73   : > { %604 = vmatpush.msra.mxu1 %v580_v4  ;;  %v613_v17 = vld [vmem:[#allocation11 + $0x10] sm:$0xff]  ;;  %v612_v18 = vld [vmem:[#allocation11 + $0x8] sm:$0xff]  ;;  %v611_v19 = vld [vmem:[#allocation11] sm:$0xff]  ;;  %s1013_s21 = sshll.u32 %s544_s27, 4  ;;  %s1015_s15 = sshll.u32 %s1011_s25, 4  ;;  %s1014_s21 = int_to_ptr.vmem [resolvable:$true] %s1013_s21  ;;  %s1016_s15 = int_to_ptr.hbm [resolvable:$true] %s1015_s15 }
  0x74   : > { %572 = vmatpush.msra.mxu0 %v547_v5  ;;  %635 = vmatpush.msra.mxu2 %v613_v17  ;;  %v610_v20 = vld [vmem:[%s475_s10] sm:$0xff]  ;;  %s2043_s10 = sld [smem:[#allocation30_spill]]  ;;  %s1001_s17 = scalar_lea.sflag [#allocation4], %s1870_s14 }
  0x75   : > { %605 = vmatpush.msra.mxu1 %v579_v6  ;;  %v1316_v29 = vld [vmem:[%s2000_s9] ss:$0 sm:$0xff]  ;;  %s1558_s24 = sshra.s32 %s1016_s15, 4  ;;  %s1564_s26 = scalar_lea.hbm %s2002_s11, 16  ;;  %s1559_s24 = int_to_ptr.hbm [resolvable:$true] %s1558_s24 }
  0x76   : > { %573 = vmatpush.msra.mxu0 %v546_v7  ;;  %1190 = vmatmul.msk.f32.vlgmr.msra.gmra.mxu1 %vm554_vm0, %v578_v8  ;;  %p1565_p8 = scmp.lt.s32.totalorder %s1559_s24, %s2002_s11 }
  0x77   : > { %1189 = vmatmul.msk.f32.vlgmr.msra.gmra.mxu0 %vm554_vm0, %v545_v9  ;;  %636 = vmatpush.msra.mxu2 %v612_v18 }
  0x79   : > { %637 = vmatpush.msra.mxu2 %v611_v19 }
  0x7a   : > { %1191 = vmatmul.msk.f32.vlgmr.msra.gmra.mxu2 %vm554_vm0, %v610_v20 }
  0xf3   : > { %v607_v12 = vpop.f32.mrf.mxu1 }
  0xf4   : > { %v575_v13 = vpop.f32.mrf.mxu0  ;;  %v608_v14 = vadd.f32 %v1314_v10, %v607_v12 }
  0xf5   : > { %v576_v15 = vadd.f32 %v1315_v11, %v575_v13 }
  0xf6   : > { %875 = vrot.lane.b32.xlu2 %v608_v14, %s1630_s20  ;;  %718 = vrot.lane.b32.xlu1 %v608_v14, %s1631_s1 }
  0xf7   : > { %797 = vrot.lane.b32.xlu0 %v608_v14, %s1632_s6  ;;  %1192 = vmatpush.xpose.msk.msra.mxu3 %vm642_vm1, %v608_v14 }
  0xfa   : > { %1193 = vmatmul.msk.f32.vlgmr.msra.gmra.mxu3 %vm642_vm1, %v576_v15 }
  0xfd   : > { %v639_v30 = vpop.f32.mrf.mxu2 }
  0xfe   : > { %873 = vrot.lane.b32.xlu2 %v576_v15, %s1630_s20  ;;  %716 = vrot.lane.b32.xlu1 %v576_v15, %s1631_s1  ;;  %v640_v31 = vadd.f32 %v1316_v29, %v639_v30 }
  0xff   : > { %795 = vrot.lane.b32.xlu0 %v576_v15, %s1632_s6 }
 0x100   : > { %711 = vmatpush.msrb.mxu3 %v640_v31 }
 0x150   : > { %v876_v22 = vpop.permute.xlu2 %875 }
 0x158   : > { %v874_v26 = vpop.permute.xlu2 %873 }
 0x168   : > { %v719_v21 = vpop.permute.xlu1 %718 }
 0x169   : > { %v798_v23 = vpop.permute.xlu0 %797  ;;  %1195 = vmatpush.xpose.msk.msrb.mxu0 %vm642_vm1, %v719_v21 }
 0x16a   : > { %1198 = vmatpush.xpose.msk.msrb.mxu2 %vm642_vm1, %v798_v23 }
 0x16d   : > { %1201 = vmatpush.xpose.msk.msra.mxu0 %vm642_vm1, %v876_v22 }
 0x170   : > { %v717_v24 = vpop.permute.xlu1 %716 }
 0x171   : > { %v796_v25 = vpop.permute.xlu0 %795  ;;  %1196 = vmatmul.msk.f32.vlgmr.msrb.gmra.mxu0 %vm642_vm1, %v717_v24 }
 0x172   : > { %1199 = vmatmul.msk.f32.vlgmr.msrb.gmra.mxu2 %vm642_vm1, %v796_v25 }
 0x179   : > { %1202 = vmatmul.msk.f32.vlgmr.msra.gmra.mxu0 %vm642_vm1, %v874_v26 }
 0x17d   : > { %v666_v27 = vpop.f32.mrf.mxu3 }
 0x17e   : > { %v669_v28 = vsel %vm642_vm1, %v666_v27, -inf }
 0x17f   : > { %670 = vmax.xlane.f32.xlu0 %v669_v28 }
 0x1ee   : > { %v741_v32 = vpop.f32.mrf.mxu0 }
 0x1ef   : > { %v744_v33 = vsel %vm642_vm1, %v741_v32, -inf }
 0x1f0   : > { %745 = vmax.xlane.f32.xlu1 %v744_v33 }
 0x1f2   : > { %v671_v34 = vpop.xlane.xlu0 %670 }
 0x1f3   : > { %v672_v35 = vsub.f32 %v666_v27, %v671_v34 }
 0x1f5   : > { %v673_v36 = vmul.f32 1.442695, %v672_v35  ;;  %v820_v37 = vpop.f32.mrf.mxu2 }
 0x1f6   : > { %v823_v38 = vsel %vm642_vm1, %v820_v37, -inf  ;;  %v898_v39 = vpop.f32.mrf.mxu0 }
 0x1f7   : > { %1318 = vpow2.f32 %v673_v36  ;;  %824 = vmax.xlane.f32.xlu2 %v823_v38  ;;  %v901_v41 = vsel %vm642_vm1, %v898_v39, -inf }
 0x1fd   : > { %v1319_v40 = vpop.eup %1318 }
 0x1fe   : > { %v675_v42 = vsel %vm642_vm1, %v1319_v40, 0.0 }
 0x1ff   : > { %902 = vmax.xlane.f32.xlu2 %v901_v41  ;;  %676 = vadd.xlane.f32.xlu0 %v675_v42 }
 0x263   : > { %v746_v43 = vpop.xlane.xlu1 %745 }
 0x264   : > { %v747_v44 = vsub.f32 %v741_v32, %v746_v43 }
 0x266   : > { %v748_v45 = vmul.f32 1.442695, %v747_v44 }
 0x268   : > { %1320 = vpow2.f32 %v748_v45 }
 0x26a   : > { %v825_v46 = vpop.xlane.xlu2 %824 }
 0x26b   : > { %v826_v47 = vsub.f32 %v820_v37, %v825_v46 }
 0x26d   : > { %v827_v48 = vmul.f32 1.442695, %v826_v47 }
 0x26e   : > { %v1929_v49 = vpop.eup %1320 }
 0x26f   : > { %1322 = vpow2.f32 %v827_v48  ;;  %v750_v50 = vsel %vm642_vm1, %v1929_v49, 0.0 }
 0x270   : > { %751 = vadd.xlane.f32.xlu1 %v750_v50  ;;  %v970_v50 = vld [vmem:[#allocation13 + $0x10] sm:$0xff] }
 0x272   : > { %v903_v51 = vpop.xlane.xlu2 %902  ;;  %v677_v52 = vpop.xlane.xlu0 %676 }
 0x273   : > { %v904_v53 = vsub.f32 %v898_v39, %v903_v51  ;;  %1324 = vrcp.f32 %v677_v52  ;;  %v689_v61 = vand.u32 2147483648, %v677_v52  ;;  %v687_v63 = vand.u32 2147483647, %v677_v52  ;;  %v969_v51 = vld [vmem:[#allocation13 + $0x8] sm:$0xff] }
 0x274   : > { %vm683_vm3 = vweird.f32 %v677_v52 }
 0x275   : > { %v1933_v54 = vpop.eup %1322  ;;  %v905_v55 = vmul.f32 1.442695, %v904_v53  ;;  %v690_v2 = vor.u32 1.1754944e-38, %v689_v61  ;;  %vm688_vm5 = vcmp.eq.f32.partialorder %v687_v63, 8.507059e+37 }
 0x276   : > { %v829_v56 = vsel %vm642_vm1, %v1933_v54, 0.0 }
 0x277   : > { %1326 = vpow2.f32 %v905_v55  ;;  %830 = vadd.xlane.f32.xlu2 %v829_v56 }
 0x279   : > { %v1325_v57 = vpop.eup %1324 }
 0x27a   : > { %v679_v58 = vmul.f32 %v1325_v57, %v677_v52  ;;  %vm684_vm2 = vweird.f32 %v1325_v57  ;;  %v968_v52 = vld [vmem:[#allocation13] sm:$0xff] }
 0x27b   : > { %vm685_vm4 = vmor %vm683_vm3, %vm684_vm2 }
 0x27c   : > { %v680_v59 = vsub.f32 1.0, %v679_v58 }
 0x27d   : > { %v1937_v60 = vpop.eup %1326 }
 0x27e   : > { %v681_v62 = vmul.f32 %v1325_v57, %v680_v59  ;;  %v907_v0 = vsel %vm642_vm1, %v1937_v60, 0.0  ;;  %v1317_v59 = vld [vmem:[%s2043_s10] ss:$0 sm:$0xff] }
 0x27f   : > { %908 = vadd.xlane.f32.xlu0 %v907_v0 }
 0x280   : > { %v682_v1 = vadd.f32 %v1325_v57, %v681_v62 }
 0x282   : > { %v686_v3 = vsel %vm685_vm4, %v1325_v57, %v682_v1  ;;  %vm964_vm4 = vcmask 130048  }
 0x283   : > { %v691_v4 = vsel %vm688_vm5, %v690_v2, %v686_v3  ;;  %vm966_vm5 = vcmask 195584  }
 0x284   : > { %v692_v5 = vmul.f32 %v1319_v40, %v691_v4 }
 0x286   : > { %1194 = vmatmul.msk.f32.vlgmr.msrb.gmra.mxu3 %vm642_vm1, %v692_v5 }
 0x289   : > { %769 = vrot.lane.b32.xlu1 %v640_v31, %s1631_s1 }
 0x28f   : > { %847 = vrot.lane.b32.xlu2 %v640_v31, %s1632_s6 }
 0x293   : > { %925 = vrot.lane.b32.xlu0 %v640_v31, %s1630_s20  ;;  %s1560_s20 = scalar_lea.hbm %s1559_s24, 8 }
 0x294   : > { %p1561_p12 = scmp.ne.s32.totalorder %s1559_s24, %s1560_s20  ;;  %p1566_p10 = scmp.lt.s32.totalorder %s1564_s26, %s1560_s20 }
 0x296   : > { %p1562_p2 = pnand %p1561_p12, %p1775_p4  ;;  %p1567_p6 = por %p1566_p10, %p1565_p8 }
 0x298   : > { %p1563_p1 = pneg %p1562_p2 }
 0x29a   : > { %p1568_p11 = pnand %p1567_p6, %p1563_p1 }
 0x2e3   : > { %v752_v6 = vpop.xlane.xlu1 %751 }
 0x2e4   : > { %1328 = vrcp.f32 %v752_v6  ;;  %v764_v14 = vand.u32 2147483648, %v752_v6  ;;  %vm758_vm7 = vweird.f32 %v752_v6  ;;  %v762_v18 = vand.u32 2147483647, %v752_v6 }
 0x2e6   : > { %v765_v22 = vor.u32 1.1754944e-38, %v764_v14  ;;  %vm763_vm10 = vcmp.eq.f32.partialorder %v762_v18, 8.507059e+37 }
 0x2ea   : > { %v1329_v7 = vpop.eup %1328  ;;  %v831_v8 = vpop.xlane.xlu2 %830 }
 0x2eb   : > { %v754_v9 = vmul.f32 %v1329_v7, %v752_v6  ;;  %1330 = vrcp.f32 %v831_v8  ;;  %vm759_vm6 = vweird.f32 %v1329_v7  ;;  %v843_v20 = vand.u32 2147483648, %v831_v8 }
 0x2ec   : > { %vm760_vm8 = vmor %vm758_vm7, %vm759_vm6  ;;  %v841_v24 = vand.u32 2147483647, %v831_v8  ;;  %vm837_vm11 = vweird.f32 %v831_v8 }
 0x2ed   : > { %v755_v10 = vsub.f32 1.0, %v754_v9  ;;  %v844_v28 = vor.u32 1.1754944e-38, %v843_v20 }
 0x2ee   : > { %vm842_vm13 = vcmp.eq.f32.partialorder %v841_v24, 8.507059e+37 }
 0x2ef   : > { %v756_v11 = vmul.f32 %v1329_v7, %v755_v10 }
 0x2f1   : > { %v1331_v12 = vpop.eup %1330  ;;  %v757_v13 = vadd.f32 %v1329_v7, %v756_v11 }
 0x2f2   : > { %v833_v15 = vmul.f32 %v1331_v12, %v831_v8  ;;  %v848_v16 = vpop.permute.xlu2 %847  ;;  %v909_v17 = vpop.xlane.xlu0 %908  ;;  %vm838_vm9 = vweird.f32 %v1331_v12 }
 0x2f3   : > { %1332 = vrcp.f32 %v909_v17  ;;  %868 = vmatpush.msra.mxu3 %v848_v16  ;;  %v761_v21 = vsel %vm760_vm8, %v1329_v7, %v757_v13  ;;  %vm839_vm12 = vmor %vm837_vm11, %vm838_vm9  ;;  %v921_v36 = vand.u32 2147483648, %v909_v17  ;;  %v919_v38 = vand.u32 2147483647, %v909_v17 }
 0x2f4   : > { %v834_v19 = vsub.f32 1.0, %v833_v15  ;;  %v766_v26 = vsel %vm763_vm10, %v765_v22, %v761_v21  ;;  %vm915_vm15 = vweird.f32 %v909_v17 }
 0x2f5   : > { %v767_v33 = vmul.f32 %v1929_v49, %v766_v26  ;;  %v922_v40 = vor.u32 1.1754944e-38, %v921_v36  ;;  %vm920_vm3 = vcmp.eq.f32.partialorder %v919_v38, 8.507059e+37  ;;  %v971_v49 = vld [vmem:[#allocation13 + $0x18] sm:$0xff] }
 0x2f6   : > { %v835_v23 = vmul.f32 %v1331_v12, %v834_v19  ;;  %991 = vmatpush.msra.mxu2 %v971_v49 }
 0x2f8   : > { %v836_v25 = vadd.f32 %v1331_v12, %v835_v23  ;;  %992 = vmatpush.msra.mxu2 %v970_v50 }
 0x2f9   : > { %v1333_v27 = vpop.eup %1332 }
 0x2fa   : > { %v840_v29 = vsel %vm839_vm12, %v1331_v12, %v836_v25  ;;  %v911_v30 = vmul.f32 %v1333_v27, %v909_v17  ;;  %vm916_vm14 = vweird.f32 %v1333_v27  ;;  %993 = vmatpush.msra.mxu2 %v969_v51 }
 0x2fb   : > { %v845_v31 = vsel %vm842_vm13, %v844_v28, %v840_v29  ;;  %v770_v32 = vpop.permute.xlu1 %769  ;;  %vm917_vm2 = vmor %vm915_vm15, %vm916_vm14 }
 0x2fc   : > { %v912_v34 = vsub.f32 1.0, %v911_v30  ;;  %790 = vmatpush.msrb.mxu1 %v770_v32  ;;  %v846_v35 = vmul.f32 %v1933_v54, %v845_v31  ;;  %994 = vmatpush.msra.mxu2 %v968_v52 }
 0x2fd   : > { %1197 = vmatmul.msk.f32.vlgmr.msrb.gmra.mxu1 %vm642_vm1, %v767_v33 }
 0x2fe   : > { %v913_v37 = vmul.f32 %v1333_v27, %v912_v34  ;;  %1200 = vmatmul.msk.f32.vlgmr.msra.gmra.mxu3 %vm642_vm1, %v846_v35 }
 0x300   : > { %v914_v39 = vadd.f32 %v1333_v27, %v913_v37 }
 0x302   : > { %v918_v41 = vsel %vm917_vm2, %v1333_v27, %v914_v39 }
 0x303   : > { %v923_v42 = vsel %vm920_vm3, %v922_v40, %v918_v41 }
 0x304   : > { %v924_v43 = vmul.f32 %v1937_v60, %v923_v42 }
 0x305   : > { %v926_v44 = vpop.permute.xlu0 %925 }
 0x306   : > { %946 = vmatpush.msra.mxu1 %v926_v44 }
 0x307   : > { %1203 = vmatmul.msk.f32.vlgmr.msra.gmra.mxu1 %vm642_vm1, %v924_v43 }
 0x309   : > { %v713_v45 = vpop.f32.mrf.mxu3 }
 0x37a   : > { %v792_v46 = vpop.f32.mrf.mxu1 }
 0x37b   : > { %952 = vrot.lane.b32.xlu1 %v792_v46, %s1633_s16 }
 0x381   : > { %v870_v47 = vpop.f32.mrf.mxu3 }
 0x382   : > { %956 = vrot.lane.b32.xlu0 %v870_v47, %s1634_s4 }
 0x384   : > { %v948_v48 = vpop.f32.mrf.mxu1 }
 0x385   : > { %960 = vrot.lane.b32.xlu2 %v948_v48, %s1635_s3 }
 0x3df   : > { %v961_v56 = vpop.permute.xlu2 %960 }
 0x3ed   : > { %v953_v53 = vpop.permute.xlu1 %952 }
 0x3ee   : > { %v963_v54 = vsel %vm642_vm1, %v713_v45, %v953_v53 }
 0x3f4   : > { %v957_v55 = vpop.permute.xlu0 %956 }
 0x3f5   : > { %v965_v57 = vsel %vm964_vm4, %v963_v54, %v957_v55 }
 0x3f6   : > { %v967_v58 = vsel %vm966_vm5, %v965_v57, %v961_v56 }
 0x3f7   : > { %1204 = vmatmul.msk.f32.vlgmr.msra.gmra.mxu2 %vm554_vm0, %v967_v58 }
 0x47a   : > { %v996_v60 = vpop.f32.mrf.mxu2 }
 0x47b   : > { %v997_v61 = vadd.f32 %v1317_v59, %v996_v60 }
 0x47d   : > { %999 = vst.msk [vmem:[%s544_s27] sm:$0xff] %vm554_vm0, %v997_v61 }
 0x47e   : > { %1571 = shalt.err (!%p1568_p11)
}
 0x47f   : > { %1231 = dma.vmem_to_hbm [thread:$0]  (%p1775_p4), %s1014_s21, 128, %s1016_s15, %s1001_s17  }
 0x480 PF: > { %s2044_s14 = sld [smem:[#allocation20_spill]] }
 0x481   : > { %s2046_s4 = sld [smem:[#allocation21_spill]] }
 0x486   : > { %s1027_s3 = sand.u32 1, %s2044_s14  }
 0x487   : > { %p2047_p13 = scmp.ge.s32.totalorder %s2046_s4, 2  ;;  %s1028_s13 = scalar_lea.sflag [#allocation4], %s1027_s3 }
 0x489   : > { %p1257_p3 = pnand %p2047_p13, %p1779_p5 }
 0x48b   : > { %p1258_p7 = pneg %p1257_p3 }
 0x48d   : > { %1605 = dma.done.wait (%p1258_p7), %s1028_s13, 128  }
 0x48e   : > { %1607 = vsyncadd (%p1258_p7), %s1028_s13, 4294967168  ;;  %s2048_s20 = sld [smem:[#allocation22_spill]]  ;;  %s2050_s17 = smov %s1614_s18 }
 0x48f   : > { %s2049_s23 = sld [smem:[#allocation23_spill]]  ;;  %s2051_s18 = smov %s1618_s19 }
 0x494   : > { %p29_p9 = scmp.ge.s32.totalorder %s2048_s20, 4  }
 0x495   : > { %s2052_s19 = smov %s2049_s23 }
 0x496   :  { %31 = sbr.rel (!%p29_p9) target bundleno = 16 (0x10), region = 149 }
 0x49b   :  { %1034 = vsyncpa [#allocation3], 1 }
 0x49c   :  { %1036 = vsyncpa [#allocation3 + $0x1], 1 }
 0x49d   :  { %1037 = vsyncpa [#allocation6], 1 }
 0x49e   :  { %1039 = vsyncpa [#allocation6 + $0x1], 1 }
 0x49f   :  { %1040 = vsyncpa [#allocation9], 1 }
 0x4a0   :  { %1041 = vsyncpa [#allocation12], 1 }
 0x4a1   :  { %1042 = vsyncpa [#allocation4], 1 }
 0x4a2   :  { %1044 = vsyncpa [#allocation4 + $0x1], 1 }

</bundles_post_ra>
